<compile_context>
chip_gen: v6e
topology: v6e:2x2x1
jax: 0.10.0
libtpu: 0.0.40
codegen_flags: <defaults>
</compile_context>

<pallas_src>
import jax
import jax.numpy as jnp
from jax.experimental import pallas as pl
from jax.experimental.pallas import tpu as pltpu

_LANE = 128
_VMEM_BUDGET_BYTES = 32 * 1024 * 1024   # conservative: fits v7x (64 MiB) and v5e/v6e


def _round_up(x, m):
    return ((x + m - 1) // m) * m


def _cdiv(a, b):
    return (a + b - 1) // b


def _mlp_kernel(x_ref, w1_ref, b1_ref, wp_ref, bp_ref, o_ref):
    """One batch tile: o = leaky_relu(x @ W1 + b1) @ Wp + bp, f32 accumulation."""
    x = x_ref[...]                                                     # (tb, Fp)
    h = jnp.dot(x, w1_ref[...], preferred_element_type=jnp.float32)    # (tb, Hp) f32 acc
    h = h + b1_ref[...]                                                # bias in f32 (VPU)
    h = jnp.maximum(h, 0.01 * h)                                       # LeakyReLU(0.01), VPU
    h = h.astype(wp_ref.dtype)                                         # bf16/f32 for 2nd MXU dot
    o = jnp.dot(h, wp_ref[...], preferred_element_type=jnp.float32)    # (tb, Op) f32 acc
    o = o + bp_ref[...]
    o_ref[...] = o.astype(o_ref.dtype)


def _choose_tb(batch, f_pad, o_pad, in_bytes, sub, weight_bytes):
    """Largest sublane-aligned batch tile fitting the VMEM budget (<=512 rows)."""
    per_row = 2 * (f_pad * in_bytes + o_pad * 4)     # double-buffered x tile + f32 out tile
    avail = max(_VMEM_BUDGET_BYTES - weight_bytes, per_row * sub)
    cap = max(avail // per_row, sub)
    tb = min(512, cap, _round_up(batch, sub))
    tb = max((tb // sub) * sub, sub)
    # Prefer >=2 grid blocks when the batch allows it (v7x has 2 TensorCores per chip).
    if _cdiv(batch, tb) < 2 and batch >= 2 * sub:
        tb = max(sub, _round_up(_cdiv(batch, 2), sub))
    return tb


def _pallas_forward(xp, w1p, b1p, wpp, bpp, *, tb, cost, single_buffer_weights):
    bp_rows, fp = xp.shape
    hp = w1p.shape[1]
    op = wpp.shape[1]

    def resident(shape):
        # Grid-invariant operand: constant index_map, so a second pipeline buffer only
        # wastes VMEM -> request single buffering.
        kwargs = {"pipeline_mode": pl.Buffered(1)} if single_buffer_weights else {}
        return pl.BlockSpec(shape, lambda i: (0, 0), **kwargs)

    return pl.pallas_call(
        _mlp_kernel,
        out_shape=jax.ShapeDtypeStruct((bp_rows, op), jnp.float32),
        grid_spec=pltpu.PrefetchScalarGridSpec(
            num_scalar_prefetch=0,
            grid=(bp_rows // tb,),
            in_specs=[
                pl.BlockSpec((tb, fp), lambda i: (i, 0)),    # x tile (pipelined over batch)
                resident((fp, hp)),                           # W1 (resident)
                resident((1, hp)),                            # b1
                resident((hp, op)),                           # Wp (resident)
                resident((1, op)),                            # bp
            ],
            out_specs=pl.BlockSpec((tb, op), lambda i: (i, 0)),
        ),
        compiler_params=pltpu.CompilerParams(
            dimension_semantics=("parallel",),
            vmem_limit_bytes=_VMEM_BUDGET_BYTES,
        ),
        cost_estimate=cost,
    )(xp, w1p, b1p, wpp, bpp)


def net_forward(x, w1, b1, wp, bp, *, matmul_dtype=jnp.bfloat16, tb=None):
    """x: (B, F); w1: (F, H); b1: (1, H); wp: (H, O); bp: (1, O) -> (B, O) float32."""
    B, F = x.shape
    H = w1.shape[1]
    O = wp.shape[1]

    in_dtype = jnp.dtype(matmul_dtype)
    in_bytes = in_dtype.itemsize
    sub = 8 * (4 // in_bytes)                 # sublane packing: 8 (f32) / 16 (bf16)

    # Lane-dense padding: pad last dims to multiples of 128 so stores are unmasked vsts
    # and MXU tiles aren't mostly masked. Zero padding contributes exactly 0 to the dots.
    Fp = _round_up(F, _LANE)
    Hp = _round_up(H, _LANE)
    Op = _round_up(O, _LANE)

    weight_bytes = (Fp * Hp + Hp * Op) * in_bytes + (Hp + Op) * 4
    if tb is None:
        tb = _choose_tb(B, Fp, Op, in_bytes, sub, weight_bytes)
    tb = max((tb // sub) * sub, sub)
    Bp = _round_up(B, tb)                     # pad batch -> no silently dropped tail rows

    xp  = jnp.pad(x,  ((0, Bp - B), (0, Fp - F))).astype(in_dtype)
    w1p = jnp.pad(w1, ((0, Fp - F), (0, Hp - H))).astype(in_dtype)
    b1p = jnp.pad(b1, ((0, 0), (0, Hp - H))).astype(jnp.float32)
    wpp = jnp.pad(wp, ((0, Hp - H), (0, Op - O))).astype(in_dtype)
    bpp = jnp.pad(bp, ((0, 0), (0, Op - O))).astype(jnp.float32)

    cost = pl.CostEstimate(
        flops=2 * B * (F * H + H * O),
        transcendentals=0,
        bytes_accessed=(x.size + w1.size + b1.size + wp.size + bp.size + B * O) * 4,
    )

    last_err = None
    for single_buf in (True, False):   # Buffered(1) support varies across JAX versions
        try:
            out = _pallas_forward(xp, w1p, b1p, wpp, bpp, tb=tb, cost=cost,
                                  single_buffer_weights=single_buf)
            return out[:B, :O]
        except Exception as e:          # noqa: BLE001 - fall back to default pipelining
            last_err = e
    raise last_err


def _init_linear(key, fan_in, fan_out, dtype=jnp.float32):
    # Deterministic init mimicking torch.nn.Linear (kaiming-uniform-ish bounds).
    kw, kb = jax.random.split(key)
    bound = 1.0 / (fan_in ** 0.5)
    # stored as (in, out) == W^T of the PyTorch (out, in) weight
    w = jax.random.uniform(kw, (fan_in, fan_out), dtype, -bound, bound)
    b = jax.random.uniform(kb, (1, fan_out), dtype, -bound, bound)
    return w, b


if __name__ == "__main__":
    key = jax.random.PRNGKey(0)
    k_x, k_h1, k_p = jax.random.split(key, 3)

    # Small shapes consistent with Net(n_feature, n_hidden, n_output, layers=2)
    B, n_feature, n_hidden, n_output = 8, 16, 32, 8

    x = jax.random.normal(k_x, (B, n_feature), jnp.float32)
    w1, b1 = _init_linear(k_h1, n_feature, n_hidden)
    wp, bp = _init_linear(k_p, n_hidden, n_output)

    # Pure-JAX f32 reference (eval-mode dropout == identity).
    h_ref = x @ w1 + b1
    h_ref = jnp.maximum(h_ref, 0.01 * h_ref)
    ref = h_ref @ wp + bp

    # f32 matmul path: exact parity with the PyTorch eval forward.
    out_f32 = net_forward(x, w1, b1, wp, bp, matmul_dtype=jnp.float32)
    jax.block_until_ready(out_f32)
    assert out_f32.shape == (B, n_output)
    assert jnp.allclose(out_f32, ref, atol=1e-5, rtol=1e-5)

    # bf16 matmul-input path (MXU-native on v6e/v7x); f32 accumulation & epilogue.
    out_bf16 = net_forward(x, w1, b1, wp, bp, matmul_dtype=jnp.bfloat16)
    jax.block_until_ready(out_bf16)
    assert out_bf16.shape == (B, n_output)
    assert jnp.allclose(out_bf16, ref, atol=2e-2, rtol=2e-2)

    print("KERNEL_OK")
</pallas_src>

<mosaic_0001>
module attributes {stable_mosaic.version = 11 : i64} {
  func.func @_mlp_kernel(%arg0: i32, %arg1: memref<8x128xf32, #tpu.memory_space<vmem>>, %arg2: memref<128x128xf32, #tpu.memory_space<vmem>>, %arg3: memref<1x128xf32, #tpu.memory_space<vmem>>, %arg4: memref<128x128xf32, #tpu.memory_space<vmem>>, %arg5: memref<1x128xf32, #tpu.memory_space<vmem>>, %arg6: memref<8x128xf32, #tpu.memory_space<vmem>>) attributes {dimension_semantics = [#tpu.dimension_semantics<parallel>], iteration_bounds = array<i64: 1>, scalar_prefetch = 0 : i64, scratch_operands = 0 : i64, tpu.core_type = #tpu.core_type<tc>, window_params = [{transform_indices = @transform_0, window_bounds = array<i64: 8, 128>}, {pipeline_mode = #tpu.pipeline_mode<synchronous>, transform_indices = @transform_1, window_bounds = array<i64: 128, 128>}, {pipeline_mode = #tpu.pipeline_mode<synchronous>, transform_indices = @transform_2, window_bounds = array<i64: 1, 128>}, {pipeline_mode = #tpu.pipeline_mode<synchronous>, transform_indices = @transform_3, window_bounds = array<i64: 128, 128>}, {pipeline_mode = #tpu.pipeline_mode<synchronous>, transform_indices = @transform_4, window_bounds = array<i64: 1, 128>}, {transform_indices = @transform_5, window_bounds = array<i64: 8, 128>}]} {
    %c0 = arith.constant 0 : index
    %c0_0 = arith.constant 0 : index
    %0 = vector.load %arg1[%c0, %c0_0] : memref<8x128xf32, #tpu.memory_space<vmem>>, vector<8x128xf32>
    %c0_1 = arith.constant 0 : index
    %c0_2 = arith.constant 0 : index
    %1 = vector.load %arg2[%c0_1, %c0_2] : memref<128x128xf32, #tpu.memory_space<vmem>>, vector<128x128xf32>
    %cst = arith.constant dense<0.000000e+00> : vector<8x128xf32>
    %2 = tpu.matmul %0, %1, %cst {dimension_numbers = #tpu.dot_dimension_numbers<[1], [0], [0], [1], [0, 0, 1, 1], [], []>} : vector<8x128xf32>, vector<128x128xf32>, vector<8x128xf32> -> vector<8x128xf32>
    %c0_3 = arith.constant 0 : index
    %c0_4 = arith.constant 0 : index
    %3 = vector.load %arg3[%c0_3, %c0_4] : memref<1x128xf32, #tpu.memory_space<vmem>>, vector<1x128xf32>
    %4 = vector.broadcast %3 : vector<1x128xf32> to vector<8x128xf32>
    %5 = arith.addf %2, %4 : vector<8x128xf32>
    %cst_5 = arith.constant 0.00999999977 : f32
    %6 = vector.broadcast %cst_5 : f32 to vector<8x128xf32>
    %7 = arith.mulf %6, %5 : vector<8x128xf32>
    %8 = arith.maximumf %5, %7 : vector<8x128xf32>
    %c0_6 = arith.constant 0 : index
    %c0_7 = arith.constant 0 : index
    %9 = vector.load %arg4[%c0_6, %c0_7] : memref<128x128xf32, #tpu.memory_space<vmem>>, vector<128x128xf32>
    %cst_8 = arith.constant dense<0.000000e+00> : vector<8x128xf32>
    %10 = tpu.matmul %8, %9, %cst_8 {dimension_numbers = #tpu.dot_dimension_numbers<[1], [0], [0], [1], [0, 0, 1, 1], [], []>} : vector<8x128xf32>, vector<128x128xf32>, vector<8x128xf32> -> vector<8x128xf32>
    %c0_9 = arith.constant 0 : index
    %c0_10 = arith.constant 0 : index
    %11 = vector.load %arg5[%c0_9, %c0_10] : memref<1x128xf32, #tpu.memory_space<vmem>>, vector<1x128xf32>
    %12 = vector.broadcast %11 : vector<1x128xf32> to vector<8x128xf32>
    %13 = arith.addf %10, %12 : vector<8x128xf32>
    %c0_11 = arith.constant 0 : index
    %c0_12 = arith.constant 0 : index
    %14 = vector.load %arg6[%c0_11, %c0_12] : memref<8x128xf32, #tpu.memory_space<vmem>>, vector<8x128xf32>
    tpu.vector_store %arg6[%c0_11, %c0_12], %13 {strides = array<i32>} : memref<8x128xf32, #tpu.memory_space<vmem>>, vector<8x128xf32>,
    return
  }
  func.func @transform_0(%arg0: i32) -> (i32, i32) {
    %c0_i32 = arith.constant 0 : i32
    %c0_i32_0 = arith.constant 0 : i32
    return %arg0, %c0_i32 : i32, i32
  }
  func.func @transform_1(%arg0: i32) -> (i32, i32) {
    %c0_i32 = arith.constant 0 : i32
    %c0_i32_0 = arith.constant 0 : i32
    %c0_i32_1 = arith.constant 0 : i32
    return %c0_i32, %c0_i32_0 : i32, i32
  }
  func.func @transform_2(%arg0: i32) -> (i32, i32) {
    %c0_i32 = arith.constant 0 : i32
    %c0_i32_0 = arith.constant 0 : i32
    %c0_i32_1 = arith.constant 0 : i32
    return %c0_i32, %c0_i32_0 : i32, i32
  }
  func.func @transform_3(%arg0: i32) -> (i32, i32) {
    %c0_i32 = arith.constant 0 : i32
    %c0_i32_0 = arith.constant 0 : i32
    %c0_i32_1 = arith.constant 0 : i32
    return %c0_i32, %c0_i32_0 : i32, i32
  }
  func.func @transform_4(%arg0: i32) -> (i32, i32) {
    %c0_i32 = arith.constant 0 : i32
    %c0_i32_0 = arith.constant 0 : i32
    %c0_i32_1 = arith.constant 0 : i32
    return %c0_i32, %c0_i32_0 : i32, i32
  }
  func.func @transform_5(%arg0: i32) -> (i32, i32) {
    %c0_i32 = arith.constant 0 : i32
    %c0_i32_0 = arith.constant 0 : i32
    return %arg0, %c0_i32 : i32, i32
  }
}

module attributes {stable_mosaic.version = 11 : i64} {
  func.func @_mlp_kernel(%arg0: i32, %arg1: memref<8x128xf32, #tpu.memory_space<vmem>>, %arg2: memref<128x128xf32, #tpu.memory_space<vmem>>, %arg3: memref<1x128xf32, #tpu.memory_space<vmem>>, %arg4: memref<128x128xf32, #tpu.memory_space<vmem>>, %arg5: memref<1x128xf32, #tpu.memory_space<vmem>>, %arg6: memref<8x128xf32, #tpu.memory_space<vmem>>) attributes {dimension_semantics = [#tpu.dimension_semantics<parallel>], iteration_bounds = array<i64: 1>, scalar_prefetch = 0 : i64, scratch_operands = 0 : i64, tpu.core_type = #tpu.core_type<tc>, window_params = [{transform_indices = @transform_0, window_bounds = array<i64: 8, 128>}, {pipeline_mode = #tpu.pipeline_mode<synchronous>, transform_indices = @transform_1, window_bounds = array<i64: 128, 128>}, {pipeline_mode = #tpu.pipeline_mode<synchronous>, transform_indices = @transform_2, window_bounds = array<i64: 1, 128>}, {pipeline_mode = #tpu.pipeline_mode<synchronous>, transform_indices = @transform_3, window_bounds = array<i64: 128, 128>}, {pipeline_mode = #tpu.pipeline_mode<synchronous>, transform_indices = @transform_4, window_bounds = array<i64: 1, 128>}, {transform_indices = @transform_5, window_bounds = array<i64: 8, 128>}]} {
    %c0 = arith.constant 0 : index
    %c0_0 = arith.constant 0 : index
    %0 = vector.load %arg1[%c0, %c0_0] : memref<8x128xf32, #tpu.memory_space<vmem>>, vector<8x128xf32>
    %c0_1 = arith.constant 0 : index
    %c0_2 = arith.constant 0 : index
    %1 = vector.load %arg2[%c0_1, %c0_2] : memref<128x128xf32, #tpu.memory_space<vmem>>, vector<128x128xf32>
    %cst = arith.constant dense<0.000000e+00> : vector<8x128xf32>
    %2 = tpu.matmul %0, %1, %cst {dimension_numbers = #tpu.dot_dimension_numbers<[1], [0], [0], [1], [0, 0, 1, 1], [], []>} : vector<8x128xf32>, vector<128x128xf32>, vector<8x128xf32> -> vector<8x128xf32>
    %c0_3 = arith.constant 0 : index
    %c0_4 = arith.constant 0 : index
    %3 = vector.load %arg3[%c0_3, %c0_4] : memref<1x128xf32, #tpu.memory_space<vmem>>, vector<1x128xf32>
    %4 = vector.broadcast %3 : vector<1x128xf32> to vector<8x128xf32>
    %5 = arith.addf %2, %4 : vector<8x128xf32>
    %cst_5 = arith.constant 0.00999999977 : f32
    %6 = vector.broadcast %cst_5 : f32 to vector<8x128xf32>
    %7 = arith.mulf %6, %5 : vector<8x128xf32>
    %8 = arith.maximumf %5, %7 : vector<8x128xf32>
    %c0_6 = arith.constant 0 : index
    %c0_7 = arith.constant 0 : index
    %9 = vector.load %arg4[%c0_6, %c0_7] : memref<128x128xf32, #tpu.memory_space<vmem>>, vector<128x128xf32>
    %cst_8 = arith.constant dense<0.000000e+00> : vector<8x128xf32>
    %10 = tpu.matmul %8, %9, %cst_8 {dimension_numbers = #tpu.dot_dimension_numbers<[1], [0], [0], [1], [0, 0, 1, 1], [], []>} : vector<8x128xf32>, vector<128x128xf32>, vector<8x128xf32> -> vector<8x128xf32>
    %c0_9 = arith.constant 0 : index
    %c0_10 = arith.constant 0 : index
    %11 = vector.load %arg5[%c0_9, %c0_10] : memref<1x128xf32, #tpu.memory_space<vmem>>, vector<1x128xf32>
    %12 = vector.broadcast %11 : vector<1x128xf32> to vector<8x128xf32>
    %13 = arith.addf %10, %12 : vector<8x128xf32>
    %c0_11 = arith.constant 0 : index
    %c0_12 = arith.constant 0 : index
    %14 = vector.load %arg6[%c0_11, %c0_12] : memref<8x128xf32, #tpu.memory_space<vmem>>, vector<8x128xf32>
    tpu.vector_store %arg6[%c0_11, %c0_12], %13 {strides = array<i32>} : memref<8x128xf32, #tpu.memory_space<vmem>>, vector<8x128xf32>,
    return
  }
  func.func @transform_0(%arg0: i32) -> (i32, i32) {
    %c0_i32 = arith.constant 0 : i32
    %c0_i32_0 = arith.constant 0 : i32
    return %arg0, %c0_i32 : i32, i32
  }
  func.func @transform_1(%arg0: i32) -> (i32, i32) {
    %c0_i32 = arith.constant 0 : i32
    %c0_i32_0 = arith.constant 0 : i32
    %c0_i32_1 = arith.constant 0 : i32
    return %c0_i32, %c0_i32_0 : i32, i32
  }
  func.func @transform_2(%arg0: i32) -> (i32, i32) {
    %c0_i32 = arith.constant 0 : i32
    %c0_i32_0 = arith.constant 0 : i32
    %c0_i32_1 = arith.constant 0 : i32
    return %c0_i32, %c0_i32_0 : i32, i32
  }
  func.func @transform_3(%arg0: i32) -> (i32, i32) {
    %c0_i32 = arith.constant 0 : i32
    %c0_i32_0 = arith.constant 0 : i32
    %c0_i32_1 = arith.constant 0 : i32
    return %c0_i32, %c0_i32_0 : i32, i32
  }
  func.func @transform_4(%arg0: i32) -> (i32, i32) {
    %c0_i32 = arith.constant 0 : i32
    %c0_i32_0 = arith.constant 0 : i32
    %c0_i32_1 = arith.constant 0 : i32
    return %c0_i32, %c0_i32_0 : i32, i32
  }
  func.func @transform_5(%arg0: i32) -> (i32, i32) {
    %c0_i32 = arith.constant 0 : i32
    %c0_i32_0 = arith.constant 0 : i32
    return %arg0, %c0_i32 : i32, i32
  }
}

</mosaic_0001>

<bundles_post_ra>
// kernel: tpu_custom_call.1
= control target key start
LH: loop header
LB: loop body
LE: loop exit
PB: predicated region body
PF: predicated region fallthrough
CT: control target
= control target key end

     0   :  { %10 = vsyncpa [#allocation3], 0  ;;  %s556_s0 = inlined_call_operand.hbm [shape: f32[8,128], index: 0, kind: input, shape index: {}]   ;;  %s557_s1 = inlined_call_operand.hbm [shape: f32[128,128], index: 1, kind: input, shape index: {}]   ;;  %s558_s2 = inlined_call_operand.vmem [shape: f32[1,128], index: 2, kind: input, shape index: {}]   ;;  %s559_s3 = inlined_call_operand.hbm [shape: f32[128,128], index: 3, kind: input, shape index: {}]   ;;  %s560_s4 = inlined_call_operand.vmem [shape: f32[1,128], index: 4, kind: input, shape index: {}]   ;;  %s561_s5 = inlined_call_operand.hbm [shape: f32[8,128], index: 5, kind: output, shape index: {}]  }
   0x1   :  { %11 = vsyncpa [#allocation6], 0 }
   0x2   :  { %12 = vsyncpa [#allocation4], 0  ;;  %s466_s18 = smov [#allocation5]  }
   0x3   :  { %s28_s19 = sshll.u32 %s466_s18, 4  ;;  %s29_s19 = int_to_ptr.vmem [resolvable:$true] %s28_s19 }
   0x4   :  { %s388_s20 = scalar_lea.vmem %s29_s19, 2048  ;;  %p393_p1 = scmp.lt.s32.totalorder %s29_s19, %s29_s19 }
   0x5   :  { %p389_p0 = scmp.ne.s32.totalorder %s29_s19, %s388_s20  ;;  %p394_p2 = scmp.lt.s32.totalorder %s388_s20, %s388_s20 }
   0x7   :  { %p395_p3 = por %p394_p2, %p393_p1 }
   0x9   :  { %p396_p4 = pnand %p395_p3, %p389_p0 }
   0xb   :  { %399 = shalt.err (!%p396_p4)
}
   0xc   :  { %s467_s21 = smov 128   ;;  %s468_s22 = smov 8  }
   0xd   :  { %34 = dma.hbm_to_vmem [thread:$0]  %s557_s1, 2048, %s29_s19, [#allocation6], %s467_s21, %s467_s21, %s468_s22  }
   0xe   :  { %s469_s25 = smov [#allocation2]   ;;  %s470_s27 = smov [#allocation7]  }
   0xf   :  { %s19_s26 = sshll.u32 %s469_s25, 4  ;;  %s42_s28 = sshll.u32 %s470_s27, 4  ;;  %s20_s26 = int_to_ptr.vmem [resolvable:$true] %s19_s26  ;;  %s43_s28 = int_to_ptr.vmem [resolvable:$true] %s42_s28 }
  0x10   :  { %s408_s29 = scalar_lea.vmem %s20_s26, 128  ;;  %p413_p6 = scmp.lt.s32.totalorder %s20_s26, %s20_s26 }
  0x11   :  { %p409_p5 = scmp.ne.s32.totalorder %s20_s26, %s408_s29  ;;  %p414_p7 = scmp.lt.s32.totalorder %s408_s29, %s408_s29 }
  0x13   :  { %p415_p8 = por %p414_p7, %p413_p6 }
  0x15   :  { %p416_p9 = pnand %p415_p8, %p409_p5 }
  0x17   :  { %419 = shalt.err (!%p416_p9)
}
  0x18   :  { %22 = dma.hbm_to_vmem [thread:$0]  %s556_s0, 128, %s20_s26, [#allocation3]  }
  0x19   :  { %s428_s7 = scalar_lea.vmem %s43_s28, 2048  ;;  %p433_p11 = scmp.lt.s32.totalorder %s43_s28, %s43_s28 }
  0x1a   :  { %p429_p10 = scmp.ne.s32.totalorder %s43_s28, %s428_s7  ;;  %p434_p12 = scmp.lt.s32.totalorder %s428_s7, %s428_s7 }
  0x1c   :  { %p435_p13 = por %p434_p12, %p433_p11 }
  0x1e   :  { %p436_p0 = pnand %p435_p13, %p429_p10 }
  0x20   :  { %439 = shalt.err (!%p436_p0)
}
  0x21   :  { %48 = dma.hbm_to_vmem [thread:$0]  %s559_s3, 2048, %s43_s28, [#allocation6], %s467_s21, %s467_s21, %s468_s22  }
  0x22   :  { %460 = dma.done.wait [#allocation3], 128  }
  0x23   :  { %461 = vsyncadd [#allocation3], 4294967168 }
  0x24   :  { %462 = dma.done.wait [#allocation6], 4096  }
  0x25   :  { %463 = vsyncadd [#allocation6], 4294963200  ;;  %v471_v0 = vmov 0.0   ;;  %vm472_vm0 = vmmov 0   ;;  %v76_v1 = vld [vmem:[#allocation5 + $0x78] sm:$0xff]  ;;  %v75_v2 = vld [vmem:[#allocation5 + $0x70] sm:$0xff] }
  0x26   :  { %302 = vmatprep.subr.mxu0 %v471_v0  ;;  %334 = vmatprep.mubr.msk.f32.mxu0 %vm472_vm0, %v471_v0  ;;  %v74_v3 = vld [vmem:[#allocation5 + $0x68] sm:$0xff]  ;;  %v73_v4 = vld [vmem:[#allocation5 + $0x60] sm:$0xff]  ;;  %v171_v5 = vld [vmem:[#allocation7 + $0x78] sm:$0xff]  ;;  %s473_s11 = smov [#allocation8]  }
  0x27   :  { %337 = vmatprep.subr.mxu1 %v471_v0  ;;  %369 = vmatprep.mubr.msk.f32.mxu1 %vm472_vm0, %v471_v0  ;;  %v72_v6 = vld [vmem:[#allocation5 + $0x58] sm:$0xff]  ;;  %v170_v7 = vld [vmem:[#allocation7 + $0x70] sm:$0xff]  ;;  %v169_v8 = vld [vmem:[#allocation7 + $0x68] sm:$0xff]  ;;  %s256_s12 = sshll.u32 %s473_s11, 4  ;;  %s257_s12 = int_to_ptr.vmem [resolvable:$true] %s256_s12 }
  0x28   :  { %303 = vmatpush3.msra.mxu0 %v76_v1  ;;  %338 = vmatpush3.msra.mxu1 %v171_v5  ;;  %v71_v9 = vld [vmem:[#allocation5 + $0x50] sm:$0xff]  ;;  %v168_v10 = vld [vmem:[#allocation7 + $0x60] sm:$0xff]  ;;  %v70_v11 = vld [vmem:[#allocation5 + $0x48] sm:$0xff]  ;;  %s440_s13 = scalar_lea.vmem %s257_s12, 128  ;;  %p445_p2 = scmp.lt.s32.totalorder %s257_s12, %s257_s12 }
  0x29   :  { %304 = vmatprep.subr.mxu0 %v471_v0  ;;  %339 = vmatprep.subr.mxu1 %v471_v0  ;;  %v167_v12 = vld [vmem:[#allocation7 + $0x58] sm:$0xff]  ;;  %v69_v13 = vld [vmem:[#allocation5 + $0x40] sm:$0xff]  ;;  %v166_v14 = vld [vmem:[#allocation7 + $0x50] sm:$0xff]  ;;  %p441_p1 = scmp.ne.s32.totalorder %s257_s12, %s440_s13  ;;  %p446_p3 = scmp.lt.s32.totalorder %s440_s13, %s440_s13 }
  0x2a   :  { %305 = vmatpush3.msra.mxu0 %v75_v2  ;;  %340 = vmatpush3.msra.mxu1 %v170_v7  ;;  %v68_v15 = vld [vmem:[#allocation5 + $0x38] sm:$0xff]  ;;  %v165_v16 = vld [vmem:[#allocation7 + $0x48] sm:$0xff]  ;;  %v67_v17 = vld [vmem:[#allocation5 + $0x30] sm:$0xff] }
  0x2b   :  { %306 = vmatprep.subr.mxu0 %v471_v0  ;;  %341 = vmatprep.subr.mxu1 %v471_v0  ;;  %v164_v18 = vld [vmem:[#allocation7 + $0x40] sm:$0xff]  ;;  %v66_v19 = vld [vmem:[#allocation5 + $0x28] sm:$0xff]  ;;  %v163_v20 = vld [vmem:[#allocation7 + $0x38] sm:$0xff]  ;;  %p447_p4 = por %p446_p3, %p445_p2 }
  0x2c   :  { %307 = vmatpush3.msra.mxu0 %v74_v3  ;;  %342 = vmatpush3.msra.mxu1 %v169_v8  ;;  %v65_v21 = vld [vmem:[#allocation5 + $0x20] sm:$0xff]  ;;  %v162_v22 = vld [vmem:[#allocation7 + $0x30] sm:$0xff]  ;;  %v64_v23 = vld [vmem:[#allocation5 + $0x18] sm:$0xff] }
  0x2d   :  { %308 = vmatprep.subr.mxu0 %v471_v0  ;;  %343 = vmatprep.subr.mxu1 %v471_v0  ;;  %v161_v24 = vld [vmem:[#allocation7 + $0x28] sm:$0xff]  ;;  %v63_v25 = vld [vmem:[#allocation5 + $0x10] sm:$0xff]  ;;  %v160_v26 = vld [vmem:[#allocation7 + $0x20] sm:$0xff]  ;;  %p448_p5 = pnand %p447_p4, %p441_p1 }
  0x2e   :  { %309 = vmatpush3.msra.mxu0 %v73_v4  ;;  %344 = vmatpush3.msra.mxu1 %v168_v10  ;;  %v62_v27 = vld [vmem:[#allocation5 + $0x8] sm:$0xff]  ;;  %v61_v28 = vld [vmem:[#allocation5] sm:$0xff]  ;;  %v60_v29 = vld [vmem:[#allocation2] sm:$0xff] }
  0x2f   :  { %310 = vmatprep.subr.mxu0 %v471_v0  ;;  %345 = vmatprep.subr.mxu1 %v471_v0  ;;  %v159_v30 = vld [vmem:[#allocation7 + $0x18] sm:$0xff]  ;;  %v158_v31 = vld [vmem:[#allocation7 + $0x10] sm:$0xff]  ;;  %v157_v32 = vld [vmem:[#allocation7 + $0x8] sm:$0xff] }
  0x30   :  { %311 = vmatpush3.msra.mxu0 %v72_v6  ;;  %346 = vmatpush3.msra.mxu1 %v167_v12  ;;  %v156_v33 = vld [vmem:[#allocation7] sm:$0xff]  ;;  %v266_v34 = vld [vmem:[%s558_s2] ss:$0 sm:$0xff] }
  0x31   :  { %312 = vmatprep.subr.mxu0 %v471_v0  ;;  %347 = vmatprep.subr.mxu1 %v471_v0  ;;  %v267_v40 = vld [vmem:[%s560_s4] ss:$0 sm:$0xff] }
  0x32   :  { %313 = vmatpush3.msra.mxu0 %v71_v9  ;;  %348 = vmatpush3.msra.mxu1 %v166_v14 }
  0x33   :  { %314 = vmatprep.subr.mxu0 %v471_v0  ;;  %349 = vmatprep.subr.mxu1 %v471_v0 }
  0x34   :  { %315 = vmatpush3.msra.mxu0 %v70_v11  ;;  %350 = vmatpush3.msra.mxu1 %v165_v16 }
  0x35   :  { %316 = vmatprep.subr.mxu0 %v471_v0  ;;  %351 = vmatprep.subr.mxu1 %v471_v0 }
  0x36   :  { %317 = vmatpush3.msra.mxu0 %v69_v13  ;;  %352 = vmatpush3.msra.mxu1 %v164_v18 }
  0x37   :  { %318 = vmatprep.subr.mxu0 %v471_v0  ;;  %353 = vmatprep.subr.mxu1 %v471_v0 }
  0x38   :  { %319 = vmatpush3.msra.mxu0 %v68_v15  ;;  %354 = vmatpush3.msra.mxu1 %v163_v20 }
  0x39   :  { %320 = vmatprep.subr.mxu0 %v471_v0  ;;  %355 = vmatprep.subr.mxu1 %v471_v0 }
  0x3a   :  { %321 = vmatpush3.msra.mxu0 %v67_v17  ;;  %356 = vmatpush3.msra.mxu1 %v162_v22 }
  0x3b   :  { %322 = vmatprep.subr.mxu0 %v471_v0  ;;  %357 = vmatprep.subr.mxu1 %v471_v0 }
  0x3c   :  { %323 = vmatpush3.msra.mxu0 %v66_v19  ;;  %358 = vmatpush3.msra.mxu1 %v161_v24 }
  0x3d   :  { %324 = vmatprep.subr.mxu0 %v471_v0  ;;  %359 = vmatprep.subr.mxu1 %v471_v0 }
  0x3e   :  { %325 = vmatpush3.msra.mxu0 %v65_v21  ;;  %360 = vmatpush3.msra.mxu1 %v160_v26 }
  0x3f   :  { %326 = vmatprep.subr.mxu0 %v471_v0  ;;  %361 = vmatprep.subr.mxu1 %v471_v0 }
  0x40   :  { %327 = vmatpush3.msra.mxu0 %v64_v23  ;;  %362 = vmatpush3.msra.mxu1 %v159_v30 }
  0x41   :  { %328 = vmatprep.subr.mxu0 %v471_v0  ;;  %363 = vmatprep.subr.mxu1 %v471_v0 }
  0x42   :  { %329 = vmatpush3.msra.mxu0 %v63_v25  ;;  %364 = vmatpush3.msra.mxu1 %v158_v31 }
  0x43   :  { %330 = vmatprep.subr.mxu0 %v471_v0  ;;  %365 = vmatprep.subr.mxu1 %v471_v0 }
  0x44   :  { %331 = vmatpush3.msra.mxu0 %v62_v27  ;;  %366 = vmatpush3.msra.mxu1 %v157_v32 }
  0x45   :  { %332 = vmatprep.subr.mxu0 %v471_v0  ;;  %367 = vmatprep.subr.mxu1 %v471_v0 }
  0x46   :  { %333 = vmatpush3.msra.mxu0 %v61_v28  ;;  %368 = vmatpush3.msra.mxu1 %v156_v33 }
  0x47   :  { %335 = vmatmul.mubr.f32.vlgmr.msra.gmra.mxu0 %v60_v29 }
 0x107   :  { %v150_v35 = vpop.f32.mrf.mxu0 }
 0x108   :  { %v151_v36 = vadd.f32 %v266_v34, %v150_v35 }
 0x109   :  { %v336_v37 = vpop.f32.mrf.mxu0 }
 0x10a   :  { %v154_v38 = vmul.f32 0.01, %v151_v36 }
 0x10c   :  { %v155_v39 = vmax.f32 %v151_v36, %v154_v38 }
 0x10e   :  { %370 = vmatmul.mubr.f32.vlgmr.msra.gmra.mxu1 %v155_v39 }
 0x1ce   :  { %v245_v41 = vpop.f32.mrf.mxu1 }
 0x1cf   :  { %v246_v42 = vadd.f32 %v267_v40, %v245_v41 }
 0x1d0   :  { %v371_v43 = vpop.f32.mrf.mxu1 }
 0x1d1   :  { %249 = vst [vmem:[#allocation8] sm:$0xff] %v246_v42 }
 0x1d2   :  { %451 = shalt.err (!%p448_p5)
}
 0x1d3   :  { %259 = dma.vmem_to_hbm [thread:$0]  %s257_s12, 128, %s561_s5, [#allocation4]  }
 0x1d4   :  { %464 = dma.done.wait [#allocation4], 128  }
 0x1d5   :  { %465 = vsyncadd [#allocation4], 4294967168 }
 0x1d6   :  { %263 = vsyncpa [#allocation3], 1 }
 0x1d7   :  { %264 = vsyncpa [#allocation6], 1 }
 0x1d8   :  { %265 = vsyncpa [#allocation4], 1 }

// kernel: tpu_custom_call.1
= control target key start
LH: loop header
LB: loop body
LE: loop exit
PB: predicated region body
PF: predicated region fallthrough
CT: control target
= control target key end

     0   :  { %10 = vsyncpa [#allocation3], 0  ;;  %s556_s0 = inlined_call_operand.hbm [shape: f32[8,128], index: 0, kind: input, shape index: {}]   ;;  %s557_s1 = inlined_call_operand.hbm [shape: f32[128,128], index: 1, kind: input, shape index: {}]   ;;  %s558_s2 = inlined_call_operand.vmem [shape: f32[1,128], index: 2, kind: input, shape index: {}]   ;;  %s559_s3 = inlined_call_operand.hbm [shape: f32[128,128], index: 3, kind: input, shape index: {}]   ;;  %s560_s4 = inlined_call_operand.vmem [shape: f32[1,128], index: 4, kind: input, shape index: {}]   ;;  %s561_s5 = inlined_call_operand.hbm [shape: f32[8,128], index: 5, kind: output, shape index: {}]  }
   0x1   :  { %11 = vsyncpa [#allocation6], 0 }
   0x2   :  { %12 = vsyncpa [#allocation4], 0  ;;  %s466_s18 = smov [#allocation5]  }
   0x3   :  { %s28_s19 = sshll.u32 %s466_s18, 4  ;;  %s29_s19 = int_to_ptr.vmem [resolvable:$true] %s28_s19 }
   0x4   :  { %s388_s20 = scalar_lea.vmem %s29_s19, 2048  ;;  %p393_p1 = scmp.lt.s32.totalorder %s29_s19, %s29_s19 }
   0x5   :  { %p389_p0 = scmp.ne.s32.totalorder %s29_s19, %s388_s20  ;;  %p394_p2 = scmp.lt.s32.totalorder %s388_s20, %s388_s20 }
   0x7   :  { %p395_p3 = por %p394_p2, %p393_p1 }
   0x9   :  { %p396_p4 = pnand %p395_p3, %p389_p0 }
   0xb   :  { %399 = shalt.err (!%p396_p4)
}
   0xc   :  { %s467_s21 = smov 128   ;;  %s468_s22 = smov 8  }
   0xd   :  { %34 = dma.hbm_to_vmem [thread:$0]  %s557_s1, 2048, %s29_s19, [#allocation6], %s467_s21, %s467_s21, %s468_s22  }
   0xe   :  { %s469_s25 = smov [#allocation2]   ;;  %s470_s27 = smov [#allocation7]  }
   0xf   :  { %s19_s26 = sshll.u32 %s469_s25, 4  ;;  %s42_s28 = sshll.u32 %s470_s27, 4  ;;  %s20_s26 = int_to_ptr.vmem [resolvable:$true] %s19_s26  ;;  %s43_s28 = int_to_ptr.vmem [resolvable:$true] %s42_s28 }
  0x10   :  { %s408_s29 = scalar_lea.vmem %s20_s26, 128  ;;  %p413_p6 = scmp.lt.s32.totalorder %s20_s26, %s20_s26 }
  0x11   :  { %p409_p5 = scmp.ne.s32.totalorder %s20_s26, %s408_s29  ;;  %p414_p7 = scmp.lt.s32.totalorder %s408_s29, %s408_s29 }
  0x13   :  { %p415_p8 = por %p414_p7, %p413_p6 }
  0x15   :  { %p416_p9 = pnand %p415_p8, %p409_p5 }
  0x17   :  { %419 = shalt.err (!%p416_p9)
}
  0x18   :  { %22 = dma.hbm_to_vmem [thread:$0]  %s556_s0, 128, %s20_s26, [#allocation3]  }
  0x19   :  { %s428_s7 = scalar_lea.vmem %s43_s28, 2048  ;;  %p433_p11 = scmp.lt.s32.totalorder %s43_s28, %s43_s28 }
  0x1a   :  { %p429_p10 = scmp.ne.s32.totalorder %s43_s28, %s428_s7  ;;  %p434_p12 = scmp.lt.s32.totalorder %s428_s7, %s428_s7 }
  0x1c   :  { %p435_p13 = por %p434_p12, %p433_p11 }
  0x1e   :  { %p436_p0 = pnand %p435_p13, %p429_p10 }
  0x20   :  { %439 = shalt.err (!%p436_p0)
}
  0x21   :  { %48 = dma.hbm_to_vmem [thread:$0]  %s559_s3, 2048, %s43_s28, [#allocation6], %s467_s21, %s467_s21, %s468_s22  }
  0x22   :  { %460 = dma.done.wait [#allocation3], 128  }
  0x23   :  { %461 = vsyncadd [#allocation3], 4294967168 }
  0x24   :  { %462 = dma.done.wait [#allocation6], 4096  }
  0x25   :  { %463 = vsyncadd [#allocation6], 4294963200  ;;  %v471_v0 = vmov 0.0   ;;  %vm472_vm0 = vmmov 0   ;;  %v76_v1 = vld [vmem:[#allocation5 + $0x78] sm:$0xff]  ;;  %v75_v2 = vld [vmem:[#allocation5 + $0x70] sm:$0xff] }
  0x26   :  { %302 = vmatprep.subr.mxu0 %v471_v0  ;;  %334 = vmatprep.mubr.msk.f32.mxu0 %vm472_vm0, %v471_v0  ;;  %v74_v3 = vld [vmem:[#allocation5 + $0x68] sm:$0xff]  ;;  %v73_v4 = vld [vmem:[#allocation5 + $0x60] sm:$0xff]  ;;  %v171_v5 = vld [vmem:[#allocation7 + $0x78] sm:$0xff]  ;;  %s473_s11 = smov [#allocation8]  }
  0x27   :  { %337 = vmatprep.subr.mxu1 %v471_v0  ;;  %369 = vmatprep.mubr.msk.f32.mxu1 %vm472_vm0, %v471_v0  ;;  %v72_v6 = vld [vmem:[#allocation5 + $0x58] sm:$0xff]  ;;  %v170_v7 = vld [vmem:[#allocation7 + $0x70] sm:$0xff]  ;;  %v169_v8 = vld [vmem:[#allocation7 + $0x68] sm:$0xff]  ;;  %s256_s12 = sshll.u32 %s473_s11, 4  ;;  %s257_s12 = int_to_ptr.vmem [resolvable:$true] %s256_s12 }
  0x28   :  { %303 = vmatpush3.msra.mxu0 %v76_v1  ;;  %338 = vmatpush3.msra.mxu1 %v171_v5  ;;  %v71_v9 = vld [vmem:[#allocation5 + $0x50] sm:$0xff]  ;;  %v168_v10 = vld [vmem:[#allocation7 + $0x60] sm:$0xff]  ;;  %v70_v11 = vld [vmem:[#allocation5 + $0x48] sm:$0xff]  ;;  %s440_s13 = scalar_lea.vmem %s257_s12, 128  ;;  %p445_p2 = scmp.lt.s32.totalorder %s257_s12, %s257_s12 }
  0x29   :  { %304 = vmatprep.subr.mxu0 %v471_v0  ;;  %339 = vmatprep.subr.mxu1 %v471_v0  ;;  %v167_v12 = vld [vmem:[#allocation7 + $0x58] sm:$0xff]  ;;  %v69_v13 = vld [vmem:[#allocation5 + $0x40] sm:$0xff]  ;;  %v166_v14 = vld [vmem:[#allocation7 + $0x50] sm:$0xff]  ;;  %p441_p1 = scmp.ne.s32.totalorder %s257_s12, %s440_s13  ;;  %p446_p3 = scmp.lt.s32.totalorder %s440_s13, %s440_s13 }
  0x2a   :  { %305 = vmatpush3.msra.mxu0 %v75_v2  ;;  %340 = vmatpush3.msra.mxu1 %v170_v7  ;;  %v68_v15 = vld [vmem:[#allocation5 + $0x38] sm:$0xff]  ;;  %v165_v16 = vld [vmem:[#allocation7 + $0x48] sm:$0xff]  ;;  %v67_v17 = vld [vmem:[#allocation5 + $0x30] sm:$0xff] }
  0x2b   :  { %306 = vmatprep.subr.mxu0 %v471_v0  ;;  %341 = vmatprep.subr.mxu1 %v471_v0  ;;  %v164_v18 = vld [vmem:[#allocation7 + $0x40] sm:$0xff]  ;;  %v66_v19 = vld [vmem:[#allocation5 + $0x28] sm:$0xff]  ;;  %v163_v20 = vld [vmem:[#allocation7 + $0x38] sm:$0xff]  ;;  %p447_p4 = por %p446_p3, %p445_p2 }
  0x2c   :  { %307 = vmatpush3.msra.mxu0 %v74_v3  ;;  %342 = vmatpush3.msra.mxu1 %v169_v8  ;;  %v65_v21 = vld [vmem:[#allocation5 + $0x20] sm:$0xff]  ;;  %v162_v22 = vld [vmem:[#allocation7 + $0x30] sm:$0xff]  ;;  %v64_v23 = vld [vmem:[#allocation5 + $0x18] sm:$0xff] }
  0x2d   :  { %308 = vmatprep.subr.mxu0 %v471_v0  ;;  %343 = vmatprep.subr.mxu1 %v471_v0  ;;  %v161_v24 = vld [vmem:[#allocation7 + $0x28] sm:$0xff]  ;;  %v63_v25 = vld [vmem:[#allocation5 + $0x10] sm:$0xff]  ;;  %v160_v26 = vld [vmem:[#allocation7 + $0x20] sm:$0xff]  ;;  %p448_p5 = pnand %p447_p4, %p441_p1 }
  0x2e   :  { %309 = vmatpush3.msra.mxu0 %v73_v4  ;;  %344 = vmatpush3.msra.mxu1 %v168_v10  ;;  %v62_v27 = vld [vmem:[#allocation5 + $0x8] sm:$0xff]  ;;  %v61_v28 = vld [vmem:[#allocation5] sm:$0xff]  ;;  %v60_v29 = vld [vmem:[#allocation2] sm:$0xff] }
  0x2f   :  { %310 = vmatprep.subr.mxu0 %v471_v0  ;;  %345 = vmatprep.subr.mxu1 %v471_v0  ;;  %v159_v30 = vld [vmem:[#allocation7 + $0x18] sm:$0xff]  ;;  %v158_v31 = vld [vmem:[#allocation7 + $0x10] sm:$0xff]  ;;  %v157_v32 = vld [vmem:[#allocation7 + $0x8] sm:$0xff] }
  0x30   :  { %311 = vmatpush3.msra.mxu0 %v72_v6  ;;  %346 = vmatpush3.msra.mxu1 %v167_v12  ;;  %v156_v33 = vld [vmem:[#allocation7] sm:$0xff]  ;;  %v266_v34 = vld [vmem:[%s558_s2] ss:$0 sm:$0xff] }
  0x31   :  { %312 = vmatprep.subr.mxu0 %v471_v0  ;;  %347 = vmatprep.subr.mxu1 %v471_v0  ;;  %v267_v40 = vld [vmem:[%s560_s4] ss:$0 sm:$0xff] }
  0x32   :  { %313 = vmatpush3.msra.mxu0 %v71_v9  ;;  %348 = vmatpush3.msra.mxu1 %v166_v14 }
  0x33   :  { %314 = vmatprep.subr.mxu0 %v471_v0  ;;  %349 = vmatprep.subr.mxu1 %v471_v0 }
  0x34   :  { %315 = vmatpush3.msra.mxu0 %v70_v11  ;;  %350 = vmatpush3.msra.mxu1 %v165_v16 }
  0x35   :  { %316 = vmatprep.subr.mxu0 %v471_v0  ;;  %351 = vmatprep.subr.mxu1 %v471_v0 }
  0x36   :  { %317 = vmatpush3.msra.mxu0 %v69_v13  ;;  %352 = vmatpush3.msra.mxu1 %v164_v18 }
  0x37   :  { %318 = vmatprep.subr.mxu0 %v471_v0  ;;  %353 = vmatprep.subr.mxu1 %v471_v0 }
  0x38   :  { %319 = vmatpush3.msra.mxu0 %v68_v15  ;;  %354 = vmatpush3.msra.mxu1 %v163_v20 }
  0x39   :  { %320 = vmatprep.subr.mxu0 %v471_v0  ;;  %355 = vmatprep.subr.mxu1 %v471_v0 }
  0x3a   :  { %321 = vmatpush3.msra.mxu0 %v67_v17  ;;  %356 = vmatpush3.msra.mxu1 %v162_v22 }
  0x3b   :  { %322 = vmatprep.subr.mxu0 %v471_v0  ;;  %357 = vmatprep.subr.mxu1 %v471_v0 }
  0x3c   :  { %323 = vmatpush3.msra.mxu0 %v66_v19  ;;  %358 = vmatpush3.msra.mxu1 %v161_v24 }
  0x3d   :  { %324 = vmatprep.subr.mxu0 %v471_v0  ;;  %359 = vmatprep.subr.mxu1 %v471_v0 }
  0x3e   :  { %325 = vmatpush3.msra.mxu0 %v65_v21  ;;  %360 = vmatpush3.msra.mxu1 %v160_v26 }
  0x3f   :  { %326 = vmatprep.subr.mxu0 %v471_v0  ;;  %361 = vmatprep.subr.mxu1 %v471_v0 }
  0x40   :  { %327 = vmatpush3.msra.mxu0 %v64_v23  ;;  %362 = vmatpush3.msra.mxu1 %v159_v30 }
  0x41   :  { %328 = vmatprep.subr.mxu0 %v471_v0  ;;  %363 = vmatprep.subr.mxu1 %v471_v0 }
  0x42   :  { %329 = vmatpush3.msra.mxu0 %v63_v25  ;;  %364 = vmatpush3.msra.mxu1 %v158_v31 }
  0x43   :  { %330 = vmatprep.subr.mxu0 %v471_v0  ;;  %365 = vmatprep.subr.mxu1 %v471_v0 }
  0x44   :  { %331 = vmatpush3.msra.mxu0 %v62_v27  ;;  %366 = vmatpush3.msra.mxu1 %v157_v32 }
  0x45   :  { %332 = vmatprep.subr.mxu0 %v471_v0  ;;  %367 = vmatprep.subr.mxu1 %v471_v0 }
  0x46   :  { %333 = vmatpush3.msra.mxu0 %v61_v28  ;;  %368 = vmatpush3.msra.mxu1 %v156_v33 }
  0x47   :  { %335 = vmatmul.mubr.f32.vlgmr.msra.gmra.mxu0 %v60_v29 }
 0x107   :  { %v150_v35 = vpop.f32.mrf.mxu0 }
 0x108   :  { %v151_v36 = vadd.f32 %v266_v34, %v150_v35 }
 0x109   :  { %v336_v37 = vpop.f32.mrf.mxu0 }
 0x10a   :  { %v154_v38 = vmul.f32 0.01, %v151_v36 }
 0x10c   :  { %v155_v39 = vmax.f32 %v151_v36, %v154_v38 }
 0x10e   :  { %370 = vmatmul.mubr.f32.vlgmr.msra.gmra.mxu1 %v155_v39 }
 0x1ce   :  { %v245_v41 = vpop.f32.mrf.mxu1 }
 0x1cf   :  { %v246_v42 = vadd.f32 %v267_v40, %v245_v41 }
 0x1d0   :  { %v371_v43 = vpop.f32.mrf.mxu1 }
 0x1d1   :  { %249 = vst [vmem:[#allocation8] sm:$0xff] %v246_v42 }
 0x1d2   :  { %451 = shalt.err (!%p448_p5)
}
 0x1d3   :  { %259 = dma.vmem_to_hbm [thread:$0]  %s257_s12, 128, %s561_s5, [#allocation4]  }
 0x1d4   :  { %464 = dma.done.wait [#allocation4], 128  }
 0x1d5   :  { %465 = vsyncadd [#allocation4], 4294967168 }
 0x1d6   :  { %263 = vsyncpa [#allocation3], 1 }
 0x1d7   :  { %264 = vsyncpa [#allocation6], 1 }
 0x1d8   :  { %265 = vsyncpa [#allocation4], 1 }

</bundles_post_ra>
